<compile_context>
chip_gen: v7x
topology: tpu7x:2x2x1
jax: 0.10.0
libtpu: 0.0.40
codegen_flags: <defaults>
</compile_context>

<pallas_src>
import numpy as np
import jax
import jax.numpy as jnp
from jax.experimental import pallas as pl
from jax.experimental.pallas import tpu as pltpu

try:  # prefer scipy's C/Cython LAP solver for the host-side assignment
    from scipy.optimize import linear_sum_assignment as _scipy_lsa
except Exception:  # pragma: no cover - scipy not installed
    _scipy_lsa = None

_EPS = 1e-8


def _round_up(x: int, m: int) -> int:
    return ((x + m - 1) // m) * m


# ----------------------------------------------------------------------------
# Pallas kernel: per-image, row-tiled pairwise matching cost
#   C[q, t] = w_bbox * L1(box_q, box_t)
#           + w_class * (-softmax(logits_q)[label_t])        (bf16 one-hot matmul)
#           + w_giou * (-GIoU(xyxy(box_q), xyxy(box_t)))
# ----------------------------------------------------------------------------
def _make_cost_kernel(w_class: float, w_bbox: float, w_giou: float):
    def kernel(logits_ref, boxes_ref, onehot_ref, tgt_geom_ref, c_ref):
        # logits_ref:   (TILE_Q, C_pad)  native dtype; padded classes hold -big
        # boxes_ref:    (TILE_Q, 4)      native dtype, cxcywh
        # onehot_ref:   (C_pad, T_pad)   bf16, zeros in padded columns
        # tgt_geom_ref: (8, T_pad)       f32: [cx, cy, w, h, x0, y0, x1, y1]
        # c_ref:        (TILE_Q, T_pad)  f32
        logits = logits_ref[...].astype(jnp.float32)

        # ---- unnormalized softmax numerator (denominator folded in later) ----
        m = jnp.max(logits, axis=-1, keepdims=True)
        e = jnp.exp(logits - m)                                   # (TILE_Q, C_pad)
        s = jnp.sum(e, axis=-1, keepdims=True)                    # (TILE_Q, 1)

        # ---- unnormalized class mass, single bf16 MXU pass ----
        class_mass = jnp.dot(e.astype(jnp.bfloat16), onehot_ref[...],
                             preferred_element_type=jnp.float32)  # (TILE_Q, T_pad)
        # fold -w_class and the softmax denominator into one per-row scale
        # (EUP reciprocal slot; error << the 2e-2 validation tolerance)
        class_scale = (-w_class) * pl.reciprocal(s, approx=True)  # (TILE_Q, 1)

        # ---- prediction-side geometry ----
        pb = boxes_ref[...].astype(jnp.float32)                   # (TILE_Q, 4)
        pcx, pcy, pw, ph = pb[:, 0:1], pb[:, 1:2], pb[:, 2:3], pb[:, 3:4]
        px0 = pcx - 0.5 * pw
        py0 = pcy - 0.5 * ph
        px1 = pcx + 0.5 * pw
        py1 = pcy + 0.5 * ph
        area_p = pw * ph                                          # (TILE_Q, 1)

        # ---- target geometry: precomputed in XLA, q-invariant, stays resident ----
        tg = tgt_geom_ref[...]                                    # (8, T_pad)
        tcx, tcy, tw, th = tg[0:1, :], tg[1:2, :], tg[2:3, :], tg[3:4, :]
        tx0, ty0, tx1, ty1 = tg[4:5, :], tg[5:6, :], tg[6:7, :], tg[7:8, :]
        area_t = tw * th                                          # (1, T_pad)

        # ---- cost_bbox = L1 cdist on cxcywh ----
        # TODO(synk): on v6e/v7x this elementwise block could run in bf16 for
        #             ~2x VPU throughput; kept f32 for assignment stability.
        cost_bbox = (jnp.abs(pcx - tcx) + jnp.abs(pcy - tcy)
                     + jnp.abs(pw - tw) + jnp.abs(ph - th))       # (TILE_Q, T_pad)

        # ---- cost_giou = -generalized_box_iou(xyxy) ----
        iw = jnp.maximum(jnp.minimum(px1, tx1) - jnp.maximum(px0, tx0), 0.0)
        ih = jnp.maximum(jnp.minimum(py1, ty1) - jnp.maximum(py0, ty0), 0.0)
        inter = iw * ih                                           # (TILE_Q, T_pad)
        union = area_p + area_t - inter
        # approx reciprocal runs on the (nearly idle) EUP slot; eps guards
        # degenerate zero-area boxes (incl. the zero padding).
        inv_union = pl.reciprocal(union + _EPS, approx=True)
        iou = inter * inv_union

        cw = jnp.maximum(px1, tx1) - jnp.minimum(px0, tx0)
        ch = jnp.maximum(py1, ty1) - jnp.minimum(py0, ty0)
        area_c = cw * ch
        inv_area_c = pl.reciprocal(area_c + _EPS, approx=True)
        giou = iou - (area_c - union) * inv_area_c

        c_ref[...] = (w_bbox * cost_bbox
                      - w_giou * giou
                      + class_mass * class_scale)

    return kernel


def compute_cost_blocks(pred_logits, pred_boxes, targets,
                        cost_class=1.0, cost_bbox=1.0, cost_giou=1.0):
    """Per-image matching-cost blocks, shape (B, Q_pad, T_pad) f32.

    Only the diagonal (image-b preds vs image-b targets) blocks are computed;
    cross-image entries of the DETR cost matrix are never used by the matcher.
    """
    pred_logits = jnp.asarray(pred_logits)
    pred_boxes = jnp.asarray(pred_boxes)
    B, Q, num_classes = pred_logits.shape
    sizes = [int(t["boxes"].shape[0]) for t in targets]
    T_max = max(max(sizes), 1)

    # lane/layout padding
    T_pad = _round_up(T_max, 128)
    C_pad = _round_up(num_classes, 128)
    # One q-tile per image whenever it fits (per-grid-step overhead ~0.35us and
    # the double-buffered working set is far below the VMEM limit); cap only
    # for very large query counts.
    TILE_Q = min(1024, _round_up(Q, 8))
    Q_pad = _round_up(Q, TILE_Q)
    # v7x has 2 TensorCores: make sure the parallel grid has >= 2 points.
    if B * (Q_pad // TILE_Q) < 2 and TILE_Q >= 16:
        TILE_Q = _round_up(TILE_Q // 2, 8)
        Q_pad = _round_up(Q, TILE_Q)

    # ---- predictions, padded in their NATIVE dtype (upcast inside kernel) ----
    in_dtype = pred_logits.dtype
    finfo = jnp.finfo(in_dtype)
    neg_pad = -1e9 if float(finfo.max) > 1e9 else -0.9 * float(finfo.max)
    logits = jnp.pad(pred_logits,
                     ((0, 0), (0, Q_pad - Q), (0, C_pad - num_classes)),
                     constant_values=neg_pad)
    boxes = jnp.pad(pred_boxes, ((0, 0), (0, Q_pad - Q), (0, 0)))

    # ---- per-image targets: labels -> bf16 one-hot, boxes -> (8, T_pad) geometry ----
    ids_rows, geom_rows = [], []
    for t in targets:
        s = int(t["boxes"].shape[0])
        ids = jnp.pad(jnp.asarray(t["labels"], jnp.int32), (0, T_pad - s),
                      constant_values=-1)          # -1 -> all-zero one-hot col
        bxs = jnp.pad(jnp.asarray(t["boxes"], jnp.float32),
                      ((0, T_pad - s), (0, 0)))
        cx, cy, w, h = bxs[:, 0], bxs[:, 1], bxs[:, 2], bxs[:, 3]
        geom = jnp.stack([cx, cy, w, h,
                          cx - 0.5 * w, cy - 0.5 * h,
                          cx + 0.5 * w, cy + 0.5 * h], axis=0)    # (8, T_pad)
        ids_rows.append(ids)
        geom_rows.append(geom)
    tgt_ids = jnp.stack(ids_rows)                                   # (B, T_pad)
    tgt_geom = jnp.stack(geom_rows)                                 # (B, 8, T_pad)
    # bf16 one-hot (values exactly 0/1): half the DMA, single MXU pass.
    # TODO(synk): for very large vocabularies (LVIS), build the one-hot in a
    #             VMEM scratch from scalar-prefetched tgt_ids instead.
    onehot = jnp.transpose(jax.nn.one_hot(tgt_ids, C_pad, dtype=jnp.bfloat16),
                           (0, 2, 1))                               # (B, C_pad, T_pad)

    kernel = _make_cost_kernel(float(cost_class), float(cost_bbox),
                               float(cost_giou))
    grid = (B, Q_pad // TILE_Q)
    c = pl.pallas_call(
        kernel,
        out_shape=jax.ShapeDtypeStruct((B, Q_pad, T_pad), jnp.float32),
        grid=grid,
        in_specs=[
            pl.BlockSpec((None, TILE_Q, C_pad), lambda b, q: (b, q, 0)),
            pl.BlockSpec((None, TILE_Q, 4),     lambda b, q: (b, q, 0)),
            pl.BlockSpec((None, C_pad, T_pad),  lambda b, q: (b, 0, 0)),
            pl.BlockSpec((None, 8, T_pad),      lambda b, q: (b, 0, 0)),
        ],
        out_specs=pl.BlockSpec((None, TILE_Q, T_pad), lambda b, q: (b, q, 0)),
        compiler_params=pltpu.CompilerParams(
            dimension_semantics=("parallel", "parallel"),
            vmem_limit_bytes=32 * 1024 * 1024),
    )(logits, boxes, onehot, tgt_geom)
    return c


# ----------------------------------------------------------------------------
# Host-side rectangular linear sum assignment (Hungarian / Kuhn-Munkres).
# TODO(synk): sequential combinatorial algorithm with no Pallas equivalent;
#             runs on the host (scipy C solver if available, numpy fallback).
# ----------------------------------------------------------------------------
def _linear_sum_assignment_np(cost):
    cost = np.asarray(cost, dtype=np.float64)
    n, m = cost.shape
    transposed = n > m
    if transposed:
        cost = cost.T
        n, m = m, n
    INF = 1e18
    u = np.zeros(n + 1)
    v = np.zeros(m + 1)
    p = np.zeros(m + 1, dtype=np.int64)
    way = np.zeros(m + 1, dtype=np.int64)
    for i in range(1, n + 1):
        p[0] = i
        j0 = 0
        minv = np.full(m + 1, INF)
        used = np.zeros(m + 1, dtype=bool)
        while True:
            used[j0] = True
            i0 = p[j0]
            delta = INF
            j1 = -1
            for j in range(1, m + 1):
                if not used[j]:
                    cur = cost[i0 - 1, j - 1] - u[i0] - v[j]
                    if cur < minv[j]:
                        minv[j] = cur
                        way[j] = j0
                    if minv[j] < delta:
                        delta = minv[j]
                        j1 = j
            for j in range(m + 1):
                if used[j]:
                    u[p[j]] += delta
                    v[j] -= delta
                else:
                    minv[j] -= delta
            j0 = j1
            if p[j0] == 0:
                break
        while True:
            j1 = way[j0]
            p[j0] = p[j1]
            j0 = j1
            if j0 == 0:
                break
    rows, cols = [], []
    for j in range(1, m + 1):
        if p[j] != 0:
            rows.append(p[j] - 1)
            cols.append(j - 1)
    rows = np.asarray(rows, dtype=np.int64)
    cols = np.asarray(cols, dtype=np.int64)
    if transposed:
        rows, cols = cols, rows
    order = np.argsort(rows)
    return rows[order], cols[order]


def linear_sum_assignment(cost):
    if _scipy_lsa is not None:
        r, c = _scipy_lsa(np.asarray(cost))
        return np.asarray(r, dtype=np.int64), np.asarray(c, dtype=np.int64)
    return _linear_sum_assignment_np(cost)


# ----------------------------------------------------------------------------
# HungarianMatcher (forward-only, no parameters)
# ----------------------------------------------------------------------------
class HungarianMatcher:
    def __init__(self, cost_class: float = 1, cost_bbox: float = 1,
                 cost_giou: float = 1):
        assert cost_class != 0 or cost_bbox != 0 or cost_giou != 0, \
            "all costs cant be 0"
        self.cost_class = cost_class
        self.cost_bbox = cost_bbox
        self.cost_giou = cost_giou

    def forward(self, outputs, targets, return_cost_matrix=False):
        pred_logits = outputs["pred_logits"]
        pred_boxes = outputs["pred_boxes"]
        B, Q = pred_logits.shape[:2]
        sizes = [int(t["boxes"].shape[0]) for t in targets]
        T_max = max(max(sizes), 1)

        C = compute_cost_blocks(pred_logits, pred_boxes, targets,
                                self.cost_class, self.cost_bbox,
                                self.cost_giou)

        # TODO(synk): unlike the PyTorch module, cross-image blocks of the cost
        #             matrix are never computed; only the per-image (Q, T_i)
        #             blocks actually used for matching are transferred.
        # Slim D2H: trim lane padding on device and start all transfers
        # asynchronously so the scipy solve for image b overlaps the transfer
        # of image b+1.
        blocks_dev = [C[b, :Q, :T_max] for b in range(B)]
        for blk in blocks_dev:
            fn = getattr(blk, "copy_to_host_async", None)
            if fn is not None:
                fn()

        result, C_split = [], []
        for b, blk in enumerate(blocks_dev):
            c_np = np.asarray(blk)[:, :sizes[b]]
            C_split.append(c_np)
            i, j = linear_sum_assignment(c_np)
            result.append((np.asarray(i, dtype=np.int64),
                           np.asarray(j, dtype=np.int64)))
        if return_cost_matrix:
            return result, C_split
        return result

    __call__ = forward


# ----------------------------------------------------------------------------
# Numpy reference for the cost matrix (mirrors the PyTorch math, float64)
# ----------------------------------------------------------------------------
def _reference_cost(pred_logits, pred_boxes, tgt_ids, tgt_boxes,
                    w_class, w_bbox, w_giou):
    B, Q, Cc = pred_logits.shape
    logits = np.asarray(pred_logits, np.float64).reshape(B * Q, Cc)
    boxes = np.asarray(pred_boxes, np.float64).reshape(B * Q, 4)
    tids = np.asarray(tgt_ids)
    tbox = np.asarray(tgt_boxes, np.float64)

    e = np.exp(logits - logits.max(-1, keepdims=True))
    prob = e / e.sum(-1, keepdims=True)
    cost_class = -prob[:, tids]
    cost_bbox = np.abs(boxes[:, None, :] - tbox[None, :, :]).sum(-1)

    def to_xyxy(b):
        cx, cy, w, h = b[:, 0], b[:, 1], b[:, 2], b[:, 3]
        return np.stack([cx - 0.5 * w, cy - 0.5 * h,
                         cx + 0.5 * w, cy + 0.5 * h], axis=-1)

    pb, tb = to_xyxy(boxes), to_xyxy(tbox)
    area_p = (pb[:, 2] - pb[:, 0]) * (pb[:, 3] - pb[:, 1])
    area_t = (tb[:, 2] - tb[:, 0]) * (tb[:, 3] - tb[:, 1])
    lt = np.maximum(pb[:, None, :2], tb[None, :, :2])
    rb = np.minimum(pb[:, None, 2:], tb[None, :, 2:])
    wh = np.clip(rb - lt, 0, None)
    inter = wh[..., 0] * wh[..., 1]
    union = area_p[:, None] + area_t[None, :] - inter
    iou = inter / union
    lt2 = np.minimum(pb[:, None, :2], tb[None, :, :2])
    rb2 = np.maximum(pb[:, None, 2:], tb[None, :, 2:])
    wh2 = np.clip(rb2 - lt2, 0, None)
    area_c = wh2[..., 0] * wh2[..., 1]
    giou = iou - (area_c - union) / area_c
    C = w_bbox * cost_bbox + w_class * cost_class + w_giou * (-giou)
    return C.reshape(B, Q, -1)


if __name__ == "__main__":
    key = jax.random.PRNGKey(0)
    B, Q, NUM_CLASSES = 2, 8, 16
    sizes = [3, 5]

    k1, k2, k3, k4, _ = jax.random.split(key, 5)
    pred_logits = jax.random.normal(k1, (B, Q, NUM_CLASSES), jnp.float32)
    # predicted boxes: cxcywh with strictly positive w/h
    pred_cxcy = 0.25 + 0.5 * jax.random.uniform(k2, (B, Q, 2), jnp.float32)
    pred_wh = 0.1 + 0.2 * jax.random.uniform(k3, (B, Q, 2), jnp.float32)
    pred_boxes = jnp.concatenate([pred_cxcy, pred_wh], axis=-1)

    targets = []
    tk = k4
    for s in sizes:
        tk, ka, kb, kc = jax.random.split(tk, 4)
        labels = jax.random.randint(ka, (s,), 0, NUM_CLASSES, jnp.int32)
        cxcy = 0.25 + 0.5 * jax.random.uniform(kb, (s, 2), jnp.float32)
        wh = 0.1 + 0.2 * jax.random.uniform(kc, (s, 2), jnp.float32)
        targets.append({"labels": labels,
                        "boxes": jnp.concatenate([cxcy, wh], axis=-1)})

    matcher = HungarianMatcher(cost_class=1.0, cost_bbox=1.0, cost_giou=1.0)
    outputs = {"pred_logits": pred_logits, "pred_boxes": pred_boxes}

    # run the Pallas kernel once and block on its device output
    C_dev = compute_cost_blocks(pred_logits, pred_boxes, targets,
                                1.0, 1.0, 1.0)
    jax.block_until_ready(C_dev)

    indices, C_split = matcher(outputs, targets, return_cost_matrix=True)

    # Validate the Pallas-computed per-image cost blocks against a float64
    # numpy reference (diagonal blocks of the full DETR cost matrix).
    # Tolerance 2e-2 because of the intentional bf16 MXU class matmul and the
    # EUP approximate reciprocals (softmax denom, GIoU); bbox term matches
    # far tighter.
    tgt_ids_np = np.concatenate([np.asarray(t["labels"]) for t in targets])
    tgt_boxes_np = np.concatenate([np.asarray(t["boxes"]) for t in targets])
    C_ref = _reference_cost(pred_logits, pred_boxes, tgt_ids_np, tgt_boxes_np,
                            1.0, 1.0, 1.0)                       # (B, Q, sum_T)
    offs = np.concatenate([[0], np.cumsum(sizes)])
    for b in range(B):
        ref_block = C_ref[b, :, offs[b]:offs[b + 1]]
        np.testing.assert_allclose(C_split[b], ref_block, rtol=2e-2, atol=2e-2)

    # sanity check: one-to-one matching of the right size per image
    for (i_idx, j_idx), s in zip(indices, sizes):
        assert len(i_idx) == len(j_idx) == min(Q, s)
        assert len(set(i_idx.tolist())) == len(i_idx)
        assert len(set(j_idx.tolist())) == len(j_idx)

    print("KERNEL_OK")
</pallas_src>

<mosaic_0001>
module attributes {stable_mosaic.version = 11 : i64} {
  func.func @kernel(%arg0: i32, %arg1: i32, %arg2: memref<1x8x128xf32, #tpu.memory_space<vmem>>, %arg3: memref<1x8x4xf32, #tpu.memory_space<vmem>>, %arg4: memref<1x128x128xbf16, #tpu.memory_space<vmem>>, %arg5: memref<1x8x128xf32, #tpu.memory_space<vmem>>, %arg6: memref<1x8x128xf32, #tpu.memory_space<vmem>>) attributes {dimension_semantics = [#tpu.dimension_semantics<parallel>, #tpu.dimension_semantics<parallel>], iteration_bounds = array<i64: 2, 1>, scalar_prefetch = 0 : i64, scratch_operands = 0 : i64, tpu.core_type = #tpu.core_type<tc>, window_params = [{transform_indices = @transform_0, window_bounds = array<i64: 1, 8, 128>}, {transform_indices = @transform_1, window_bounds = array<i64: 1, 8, 4>}, {transform_indices = @transform_2, window_bounds = array<i64: 1, 128, 128>}, {transform_indices = @transform_3, window_bounds = array<i64: 1, 8, 128>}, {transform_indices = @transform_4, window_bounds = array<i64: 1, 8, 128>}]} {
    %c0 = arith.constant 0 : index
    %c0_0 = arith.constant 0 : index
    %c0_1 = arith.constant 0 : index
    %0 = vector.load %arg2[%c0, %c0_0, %c0_1] : memref<1x8x128xf32, #tpu.memory_space<vmem>>, vector<1x8x128xf32>
    %1 = vector.shape_cast %0 : vector<1x8x128xf32> to vector<8x128xf32>
    %cst = arith.constant dense<0xFF800000> : vector<8xf32>
    %2 = vector.multi_reduction <maximumf>, %1, %cst [1] : vector<8x128xf32> to vector<8xf32>
    %3 = vector.shape_cast %2 : vector<8xf32> to vector<8x1xf32>
    %4 = vector.broadcast %3 : vector<8x1xf32> to vector<8x128xf32>
    %5 = arith.subf %1, %4 : vector<8x128xf32>
    %6 = math.exp %5 : vector<8x128xf32>
    %cst_2 = arith.constant dense<0.000000e+00> : vector<8xf32>
    %7 = vector.multi_reduction <add>, %6, %cst_2 [1] : vector<8x128xf32> to vector<8xf32>
    %8 = vector.shape_cast %7 : vector<8xf32> to vector<8x1xf32>
    %9 = arith.truncf %6 : vector<8x128xf32> to vector<8x128xbf16>
    %c0_3 = arith.constant 0 : index
    %c0_4 = arith.constant 0 : index
    %c0_5 = arith.constant 0 : index
    %10 = vector.load %arg4[%c0_3, %c0_4, %c0_5] : memref<1x128x128xbf16, #tpu.memory_space<vmem>>, vector<1x128x128xbf16>
    %11 = vector.shape_cast %10 : vector<1x128x128xbf16> to vector<128x128xbf16>
    %cst_6 = arith.constant dense<0.000000e+00> : vector<8x128xf32>
    %12 = tpu.matmul %9, %11, %cst_6 {dimension_numbers = #tpu.dot_dimension_numbers<[1], [0], [0], [1], [0, 0, 1, 1], [], []>} : vector<8x128xbf16>, vector<128x128xbf16>, vector<8x128xf32> -> vector<8x128xf32>
    %13 = tpu.reciprocal %8 {approx = true} : vector<8x1xf32> -> vector<8x1xf32>
    %cst_7 = arith.constant -1.000000e+00 : f32
    %14 = vector.broadcast %cst_7 : f32 to vector<8x1xf32>
    %15 = arith.mulf %14, %13 : vector<8x1xf32>
    %c0_8 = arith.constant 0 : index
    %c0_9 = arith.constant 0 : index
    %c0_10 = arith.constant 0 : index
    %16 = vector.load %arg3[%c0_8, %c0_9, %c0_10] : memref<1x8x4xf32, #tpu.memory_space<vmem>>, vector<1x8x4xf32>
    %17 = vector.shape_cast %16 : vector<1x8x4xf32> to vector<8x4xf32>
    %18 = vector.extract_strided_slice %17 {offsets = [0, 0], sizes = [8, 1], strides = [1, 1]} : vector<8x4xf32> to vector<8x1xf32>
    %19 = vector.extract_strided_slice %17 {offsets = [0, 1], sizes = [8, 1], strides = [1, 1]} : vector<8x4xf32> to vector<8x1xf32>
    %20 = vector.extract_strided_slice %17 {offsets = [0, 2], sizes = [8, 1], strides = [1, 1]} : vector<8x4xf32> to vector<8x1xf32>
    %21 = vector.extract_strided_slice %17 {offsets = [0, 3], sizes = [8, 1], strides = [1, 1]} : vector<8x4xf32> to vector<8x1xf32>
    %cst_11 = arith.constant 5.000000e-01 : f32
    %22 = vector.broadcast %cst_11 : f32 to vector<8x1xf32>
    %23 = arith.mulf %22, %20 : vector<8x1xf32>
    %24 = arith.subf %18, %23 : vector<8x1xf32>
    %cst_12 = arith.constant 5.000000e-01 : f32
    %25 = vector.broadcast %cst_12 : f32 to vector<8x1xf32>
    %26 = arith.mulf %25, %21 : vector<8x1xf32>
    %27 = arith.subf %19, %26 : vector<8x1xf32>
    %cst_13 = arith.constant 5.000000e-01 : f32
    %28 = vector.broadcast %cst_13 : f32 to vector<8x1xf32>
    %29 = arith.mulf %28, %20 : vector<8x1xf32>
    %30 = arith.addf %18, %29 : vector<8x1xf32>
    %cst_14 = arith.constant 5.000000e-01 : f32
    %31 = vector.broadcast %cst_14 : f32 to vector<8x1xf32>
    %32 = arith.mulf %31, %21 : vector<8x1xf32>
    %33 = arith.addf %19, %32 : vector<8x1xf32>
    %34 = arith.mulf %20, %21 : vector<8x1xf32>
    %c0_15 = arith.constant 0 : index
    %c0_16 = arith.constant 0 : index
    %c0_17 = arith.constant 0 : index
    %35 = vector.load %arg5[%c0_15, %c0_16, %c0_17] : memref<1x8x128xf32, #tpu.memory_space<vmem>>, vector<1x8x128xf32>
    %36 = vector.shape_cast %35 : vector<1x8x128xf32> to vector<8x128xf32>
    %37 = vector.extract_strided_slice %36 {offsets = [0, 0], sizes = [1, 128], strides = [1, 1]} : vector<8x128xf32> to vector<1x128xf32>
    %38 = vector.extract_strided_slice %36 {offsets = [1, 0], sizes = [1, 128], strides = [1, 1]} : vector<8x128xf32> to vector<1x128xf32>
    %39 = vector.extract_strided_slice %36 {offsets = [2, 0], sizes = [1, 128], strides = [1, 1]} : vector<8x128xf32> to vector<1x128xf32>
    %40 = vector.extract_strided_slice %36 {offsets = [3, 0], sizes = [1, 128], strides = [1, 1]} : vector<8x128xf32> to vector<1x128xf32>
    %41 = vector.extract_strided_slice %36 {offsets = [4, 0], sizes = [1, 128], strides = [1, 1]} : vector<8x128xf32> to vector<1x128xf32>
    %42 = vector.extract_strided_slice %36 {offsets = [5, 0], sizes = [1, 128], strides = [1, 1]} : vector<8x128xf32> to vector<1x128xf32>
    %43 = vector.extract_strided_slice %36 {offsets = [6, 0], sizes = [1, 128], strides = [1, 1]} : vector<8x128xf32> to vector<1x128xf32>
    %44 = vector.extract_strided_slice %36 {offsets = [7, 0], sizes = [1, 128], strides = [1, 1]} : vector<8x128xf32> to vector<1x128xf32>
    %45 = arith.mulf %39, %40 : vector<1x128xf32>
    %46 = vector.broadcast %18 : vector<8x1xf32> to vector<8x128xf32>
    %47 = vector.broadcast %37 : vector<1x128xf32> to vector<8x128xf32>
    %48 = arith.subf %46, %47 : vector<8x128xf32>
    %49 = math.absf %48 : vector<8x128xf32>
    %50 = vector.broadcast %19 : vector<8x1xf32> to vector<8x128xf32>
    %51 = vector.broadcast %38 : vector<1x128xf32> to vector<8x128xf32>
    %52 = arith.subf %50, %51 : vector<8x128xf32>
    %53 = math.absf %52 : vector<8x128xf32>
    %54 = arith.addf %49, %53 : vector<8x128xf32>
    %55 = vector.broadcast %20 : vector<8x1xf32> to vector<8x128xf32>
    %56 = vector.broadcast %39 : vector<1x128xf32> to vector<8x128xf32>
    %57 = arith.subf %55, %56 : vector<8x128xf32>
    %58 = math.absf %57 : vector<8x128xf32>
    %59 = arith.addf %54, %58 : vector<8x128xf32>
    %60 = vector.broadcast %21 : vector<8x1xf32> to vector<8x128xf32>
    %61 = vector.broadcast %40 : vector<1x128xf32> to vector<8x128xf32>
    %62 = arith.subf %60, %61 : vector<8x128xf32>
    %63 = math.absf %62 : vector<8x128xf32>
    %64 = arith.addf %59, %63 : vector<8x128xf32>
    %65 = vector.broadcast %30 : vector<8x1xf32> to vector<8x128xf32>
    %66 = vector.broadcast %43 : vector<1x128xf32> to vector<8x128xf32>
    %67 = arith.minimumf %65, %66 : vector<8x128xf32>
    %68 = vector.broadcast %24 : vector<8x1xf32> to vector<8x128xf32>
    %69 = vector.broadcast %41 : vector<1x128xf32> to vector<8x128xf32>
    %70 = arith.maximumf %68, %69 : vector<8x128xf32>
    %71 = arith.subf %67, %70 : vector<8x128xf32>
    %cst_18 = arith.constant 0.000000e+00 : f32
    %72 = vector.broadcast %cst_18 : f32 to vector<8x128xf32>
    %73 = arith.maximumf %71, %72 : vector<8x128xf32>
    %74 = vector.broadcast %33 : vector<8x1xf32> to vector<8x128xf32>
    %75 = vector.broadcast %44 : vector<1x128xf32> to vector<8x128xf32>
    %76 = arith.minimumf %74, %75 : vector<8x128xf32>
    %77 = vector.broadcast %27 : vector<8x1xf32> to vector<8x128xf32>
    %78 = vector.broadcast %42 : vector<1x128xf32> to vector<8x128xf32>
    %79 = arith.maximumf %77, %78 : vector<8x128xf32>
    %80 = arith.subf %76, %79 : vector<8x128xf32>
    %cst_19 = arith.constant 0.000000e+00 : f32
    %81 = vector.broadcast %cst_19 : f32 to vector<8x128xf32>
    %82 = arith.maximumf %80, %81 : vector<8x128xf32>
    %83 = arith.mulf %73, %82 : vector<8x128xf32>
    %84 = vector.broadcast %34 : vector<8x1xf32> to vector<8x128xf32>
    %85 = vector.broadcast %45 : vector<1x128xf32> to vector<8x128xf32>
    %86 = arith.addf %84, %85 : vector<8x128xf32>
    %87 = arith.subf %86, %83 : vector<8x128xf32>
    %cst_20 = arith.constant 9.99999993E-9 : f32
    %88 = vector.broadcast %cst_20 : f32 to vector<8x128xf32>
    %89 = arith.addf %87, %88 : vector<8x128xf32>
    %90 = tpu.reciprocal %89 {approx = true} : vector<8x128xf32> -> vector<8x128xf32>
    %91 = arith.mulf %83, %90 : vector<8x128xf32>
    %92 = vector.broadcast %30 : vector<8x1xf32> to vector<8x128xf32>
    %93 = vector.broadcast %43 : vector<1x128xf32> to vector<8x128xf32>
    %94 = arith.maximumf %92, %93 : vector<8x128xf32>
    %95 = vector.broadcast %24 : vector<8x1xf32> to vector<8x128xf32>
    %96 = vector.broadcast %41 : vector<1x128xf32> to vector<8x128xf32>
    %97 = arith.minimumf %95, %96 : vector<8x128xf32>
    %98 = arith.subf %94, %97 : vector<8x128xf32>
    %99 = vector.broadcast %33 : vector<8x1xf32> to vector<8x128xf32>
    %100 = vector.broadcast %44 : vector<1x128xf32> to vector<8x128xf32>
    %101 = arith.maximumf %99, %100 : vector<8x128xf32>
    %102 = vector.broadcast %27 : vector<8x1xf32> to vector<8x128xf32>
    %103 = vector.broadcast %42 : vector<1x128xf32> to vector<8x128xf32>
    %104 = arith.minimumf %102, %103 : vector<8x128xf32>
    %105 = arith.subf %101, %104 : vector<8x128xf32>
    %106 = arith.mulf %98, %105 : vector<8x128xf32>
    %cst_21 = arith.constant 9.99999993E-9 : f32
    %107 = vector.broadcast %cst_21 : f32 to vector<8x128xf32>
    %108 = arith.addf %106, %107 : vector<8x128xf32>
    %109 = tpu.reciprocal %108 {approx = true} : vector<8x128xf32> -> vector<8x128xf32>
    %110 = arith.subf %106, %87 : vector<8x128xf32>
    %111 = arith.mulf %110, %109 : vector<8x128xf32>
    %112 = arith.subf %91, %111 : vector<8x128xf32>
    %cst_22 = arith.constant 1.000000e+00 : f32
    %113 = vector.broadcast %cst_22 : f32 to vector<8x128xf32>
    %114 = arith.mulf %113, %64 : vector<8x128xf32>
    %cst_23 = arith.constant 1.000000e+00 : f32
    %115 = vector.broadcast %cst_23 : f32 to vector<8x128xf32>
    %116 = arith.mulf %115, %112 : vector<8x128xf32>
    %117 = arith.subf %114, %116 : vector<8x128xf32>
    %118 = vector.broadcast %15 : vector<8x1xf32> to vector<8x128xf32>
    %119 = arith.mulf %12, %118 : vector<8x128xf32>
    %120 = arith.addf %117, %119 : vector<8x128xf32>
    %c0_24 = arith.constant 0 : index
    %c0_25 = arith.constant 0 : index
    %c0_26 = arith.constant 0 : index
    %121 = vector.load %arg6[%c0_24, %c0_25, %c0_26] : memref<1x8x128xf32, #tpu.memory_space<vmem>>, vector<1x8x128xf32>
    %122 = vector.shape_cast %121 : vector<1x8x128xf32> to vector<8x128xf32>
    %123 = vector.shape_cast %120 : vector<8x128xf32> to vector<1x8x128xf32>
    tpu.vector_store %arg6[%c0_24, %c0_25, %c0_26], %123 {strides = array<i32>} : memref<1x8x128xf32, #tpu.memory_space<vmem>>, vector<1x8x128xf32>,
    return
  }
  func.func @transform_0(%arg0: i32, %arg1: i32) -> (i32, i32, i32) {
    %c0_i32 = arith.constant 0 : i32
    %c0_i32_0 = arith.constant 0 : i32
    return %arg0, %arg1, %c0_i32 : i32, i32, i32
  }
  func.func @transform_1(%arg0: i32, %arg1: i32) -> (i32, i32, i32) {
    %c0_i32 = arith.constant 0 : i32
    %c0_i32_0 = arith.constant 0 : i32
    return %arg0, %arg1, %c0_i32 : i32, i32, i32
  }
  func.func @transform_2(%arg0: i32, %arg1: i32) -> (i32, i32, i32) {
    %c0_i32 = arith.constant 0 : i32
    %c0_i32_0 = arith.constant 0 : i32
    %c0_i32_1 = arith.constant 0 : i32
    return %arg0, %c0_i32, %c0_i32_0 : i32, i32, i32
  }
  func.func @transform_3(%arg0: i32, %arg1: i32) -> (i32, i32, i32) {
    %c0_i32 = arith.constant 0 : i32
    %c0_i32_0 = arith.constant 0 : i32
    %c0_i32_1 = arith.constant 0 : i32
    return %arg0, %c0_i32, %c0_i32_0 : i32, i32, i32
  }
  func.func @transform_4(%arg0: i32, %arg1: i32) -> (i32, i32, i32) {
    %c0_i32 = arith.constant 0 : i32
    %c0_i32_0 = arith.constant 0 : i32
    return %arg0, %arg1, %c0_i32 : i32, i32, i32
  }
}

</mosaic_0001>

<bundles_post_ra>
// kernel: tpu_custom_call.1
= control target key start
LH: loop header
LB: loop body
LE: loop exit
PB: predicated region body
PF: predicated region fallthrough
CT: control target
= control target key end

     0   :  { %9 = vsyncpa [#allocation3], 0  ;;  %s1191_s0 = inlined_call_operand.vmem [shape: f32[2,8,128], index: 0, kind: input, shape index: {}]   ;;  %s1192_s1 = inlined_call_operand.vmem [shape: f32[2,8,4], index: 1, kind: input, shape index: {}]   ;;  %s1193_s2 = inlined_call_operand.hbm [shape: bf16[2,128,128], index: 2, kind: input, shape index: {}]   ;;  %s1194_s3 = inlined_call_operand.vmem [shape: f32[2,8,128], index: 3, kind: input, shape index: {}]   ;;  %s1195_s4 = inlined_call_operand.hbm [shape: f32[2,8,128], index: 4, kind: output, shape index: {}]  }
   0x1   :  { %11 = vsyncpa [#allocation3 + $0x1], 0 }
   0x2   :  { %12 = vsyncpa [#allocation4], 0 }
   0x3   :  { %14 = vsyncpa [#allocation4 + $0x1], 0  ;;  %s991_s15 = smov 0   ;;  %s993_s16 = smov 0  }
   0x4   :  { %s995_s17 = smov 0   ;;  %s997_s18 = smov 0  }
   0x5   :  { %s999_s19 = smov 0   ;;  %s1001_s20 = smov 0  }
   0x6 LB: > { %s689_s21 = sadd.s32 4294967295, %s952_s20   ;;  %s690_s22 = sadd.s32 4294967294, %s952_s20   ;;  %s952_s20 = sphi %s1001_s20, %s20_s20   ;;  %s948_s19 = sphi %s999_s19, %s1210_s19   ;;  %s944_s18 = sphi %s997_s18, %s1209_s18   ;;  %s940_s17 = sphi %s995_s17, %s1208_s17   ;;  %s936_s16 = sphi %s993_s16, %s1207_s16   ;;  %s932_s15 = sphi %s991_s15, %s1206_s15  }
   0x7   : > { %s32_s23 = sadd.s32 1, %s948_s19  ;;  %s95_s24 = sadd.s32 1, %s940_s17 }
   0x8   : > { %p34_p0 = scmp.ge.s32.totalorder %s32_s23, 2  ;;  %p102_p1 = scmp.ne.s32.totalorder %s940_s17, %s936_s16 }
   0x9   : > { %p103_p2 = scmp.eq.s32.totalorder %s952_s20, 0  ;;  %p108_p3 = scmp.ne.s32.totalorder %s936_s16, %s932_s15 }
   0xa   : > { %s1212_s23 = smov (%p34_p0, %s32_s23), 0  ;;  %p109_p5 = scmp.eq.s32.totalorder %s689_s21, 0 }
   0xb   : > { %p1032_p4 = por %p103_p2, %p102_p1  ;;  %s92_s26 = ssub.s32 %s948_s19, %s1212_s23 }
   0xc   : > { %p160_p6 = scmp.eq.s32.totalorder %s689_s21, 1  ;;  %p93_p7 = scmp.eq.s32.totalorder %s92_s26, 0 }
   0xd   : > { %p1038_p8 = por %p109_p5, %p108_p3  ;;  %p166_p10 = scmp.eq.s32.totalorder %s690_s22, 1 }
   0xe   : > { %p1042_p9 = por %p160_p6, %p102_p1  ;;  %p756_p13 = scmp.lt.s32.totalorder %s952_s20, 2 }
   0xf   : > { %s1047_s29 = scalar_select %p93_p7, %s940_s17, %s95_s24  }
  0x10   : > { %s1199_s28 = scalar_select %p1042_p9, 1, 0 }
  0x11   : > { %p1049_p11 = por %p166_p10, %p108_p3  ;;  %s206_s5 = sand.u32 1, %s940_s17  }
  0x12   : > { %s693_s6 = sshll.u32 %s206_s5, 6  ;;  %s714_s7 = sshll.u32 %s948_s19, 10 }
  0x13   : > { %s1200_s30 = scalar_select %p1049_p11, 1, 0 }
  0x14   : > { %s1060_s10 = scalar_lea.hbm %s1193_s2, %s714_s7  ;;  %s210_s11 = scalar_lea.vmem [#allocation2], %s693_s6 }
  0x15   : > { %s217_s12 = sshll.u32 %s210_s11, 4  ;;  %p1066_p0 = pnand %p756_p13, %p1032_p4  ;;  %s1062_s12 = int_to_ptr.vmem [resolvable:$true] %s217_s12 }
  0x16   : > { %s1071_s14 = scalar_lea.sflag [#allocation3], %s206_s5  ;;  %s840_s21 = scalar_lea.hbm %s1060_s10, 1024 }
  0x17   : > { %p841_p2 = scmp.ne.s32.totalorder %s1060_s10, %s840_s21  ;;  %p842_p3 = pneg %p1066_p0 }
  0x18   : > { %s845_s25 = scalar_lea.hbm %s1193_s2, 2048  ;;  %p846_p4 = scmp.lt.u32.totalorder %s1060_s10, %s1193_s2 }
  0x19   : > { %p843_p5 = pnand %p842_p3, %p841_p2  ;;  %p847_p7 = scmp.lt.u32.totalorder %s845_s25, %s840_s21 }
  0x1a   : > { %p849_p13 = scmp.lt.u32.totalorder %s840_s21, %s1060_s10 }
  0x1b   : > { %p844_p6 = pneg %p843_p5  ;;  %p848_p10 = por %p847_p7, %p846_p4 }
  0x1d   : > { %p850_p12 = por %p849_p13, %p848_p10 }
  0x1f   : > { %p851_p1 = pnand %p850_p12, %p844_p6 }
  0x21   : > { %854 = shalt.err (!%p851_p1)
}
  0x22   : > { %s855_s5 = scalar_lea.vmem %s1062_s12, 1024  ;;  %s954_s7 = smov [#allocation2]  }
  0x23   : > { %p856_p2 = scmp.ne.s32.totalorder %s1062_s12, %s855_s5  ;;  %s860_s8 = sshll.u32 %s954_s7, 4  ;;  %s861_s8 = int_to_ptr.vmem [resolvable:$false] %s860_s8 }
  0x24   : > { %s862_s9 = scalar_lea.vmem %s861_s8, 2048  ;;  %p863_p9 = scmp.lt.s32.totalorder %s1062_s12, %s861_s8 }
  0x25   : > { %p858_p5 = pnand %p856_p2, %p842_p3  ;;  %p864_p4 = scmp.lt.s32.totalorder %s862_s9, %s855_s5 }
  0x27   : > { %p859_p11 = pneg %p858_p5  ;;  %p865_p7 = por %p864_p4, %p863_p9 }
  0x29   : > { %p866_p10 = pnand %p865_p7, %p859_p11 }
  0x2b   : > { %869 = shalt.err (!%p866_p10)
}
  0x2c   : > { %s955_s11 = smov 64   ;;  %s956_s21 = smov 4  }
  0x2d   : > { %751 = dma.hbm_to_vmem [thread:$0]  (!%p1066_p0), %s1060_s10, 1024, %s1062_s12, %s1071_s14, %s955_s11, %s955_s11, %s956_s21  }
  0x2e   : > { %p232_p12 = scmp.lt.s32.totalorder %s952_s20, 3  ;;  %p1202_p1 = scmp.ge.s32.totalorder %s952_s20, 1 }
  0x30   : > { %p233_p3 = pnand %p1202_p1, %p232_p12 }
  0x31   : > { %s1103_s22 = sand.u32 (!%p233_p3), 1, %s936_s16  }
  0x32   : > { %236 = sbr.rel (%p233_p3) target bundleno = 454 (0x1c6), region = 36  ;;  %s697_s24 = sshll.u32 (!%p233_p3), %s1103_s22, 6 }
  0x33   : > { %s239_s25 = scalar_lea.sflag (!%p233_p3), [#allocation3], %s1103_s22  ;;  %s1107_s26 = scalar_lea.vmem (!%p233_p3), [#allocation2], %s697_s24 }
  0x39   : > { %923 = dma.done.wait (%p1038_p8), %s239_s25, 1024  }
  0x3a   : > { %925 = vsyncadd (%p1038_p8), %s239_s25, 4294966272  ;;  %p285_p9 = scmp.lt.s32.totalorder %s944_s18, 1  ;;  %v957_v0 = vmov 0.0   ;;  %s958_s8 = smov 127   ;;  %v824_v3 = vld [vmem:[%s1107_s26] sm:$0xff]   ;;  %v825_v4 = vld [vmem:[%s1107_s26 + $0x8] sm:$0xff]   ;;  %v441_v28 = vlaneseq }
  0x3b   : > { %724 = vmatprep.subr.bf16.mxu0 %v957_v0  ;;  %v826_v5 = vld [vmem:[%s1107_s26 + $0x10] sm:$0xff]   ;;  %v827_v6 = vld [vmem:[%s1107_s26 + $0x18] sm:$0xff]   ;;  %v959_v7 = vmov 2   ;;  %v828_v8 = vld [vmem:[%s1107_s26 + $0x20] sm:$0xff]   ;;  %v960_v11 = vmov 0   ;;  %s961_s9 = smov 126  }
  0x3c   : > { %s286_s10 = scalar_select %p285_p9, %s944_s18, 1  ;;  %725 = vmatpush3.bf16.msra.mxu0 %v824_v3  ;;  %816 = vset.pattern.permute.xlu1 %v959_v7  ;;  %v829_v10 = vld [vmem:[%s1107_s26 + $0x28] sm:$0xff]   ;;  %v830_v12 = vld [vmem:[%s1107_s26 + $0x30] sm:$0xff]   ;;  %v831_v13 = vld [vmem:[%s1107_s26 + $0x38] sm:$0xff]   ;;  %vm962_vm0 = vmmov 0   ;;  %v963_v14 = vmov 1  }
  0x3d   : > { %726 = vmatprep.subr.bf16.mxu0 %v957_v0  ;;  %819 = vset.pattern.permute.xlu0 %v960_v11  ;;  %v964_v15 = vmov 3   ;;  %v442_v30 = vshrl.u32 %v441_v28, 7  ;;  %s698_s25 = sshll.u32 %s1103_s22, 3  ;;  %s711_s26 = sshll.u32 %s944_s18, 7 }
  0x3e   : > { %s1115_s12 = sshll.u32 %s286_s10, 3  ;;  %740 = vmatprep.mubr.msk.bf16.mxu0 %vm962_vm0, %v957_v0  ;;  %s284_s10 = scalar_lea.vmem [#allocation5], %s698_s25 }
  0x3f   : > { %s291_s6 = scalar_lea.vmem %s1191_s0, %s1115_s12  ;;  %s298_s7 = scalar_lea.vmem %s1192_s1, %s1115_s12  ;;  %v487_v32 = vsub.s32 6, %v442_v30  ;;  %v497_v33 = vsub.s32 4, %v442_v30  ;;  %v508_v34 = vsub.s32 7, %v442_v30  ;;  %v517_v35 = vsub.s32 5, %v442_v30 }
  0x40   : > { %v304_v1 = vld [vmem:[%s291_s6] sm:$0xff]  ;;  %727 = vmatpush3.bf16.msra.mxu0 %v825_v4  ;;  %s302_s24 = scalar_lea.vmem %s1194_s3, %s1115_s12  ;;  %v464_v50 = vsub.s32 2, %v442_v30  ;;  %s568_s12 = sshll.u32 %s284_s10, 4  ;;  %s1144_s12 = int_to_ptr.vmem [resolvable:$true] %s568_s12 }
  0x41   : > { %v419_v2 = vld [vmem:[%s298_s7] sm:$0xff]  ;;  %305 = vmax.xlane.f32.xlu0 %v304_v1  ;;  %728 = vmatprep.subr.bf16.mxu0 %v957_v0  ;;  %s1142_s6 = scalar_lea.hbm %s1195_s4, %s711_s26  ;;  %s554_s18 = scalar_lea.sflag [#allocation4], %s1103_s22 }
  0x42   : > { %428 = vrot.lane.b32.xlu1 %v419_v2, %s958_s8  ;;  %v420_v9 = vmul.f32 0.5, %v419_v2  ;;  %v432_v36 = vld [vmem:[%s302_s24] sm:$0xff]  ;;  %s870_s27 = scalar_lea.vmem %s1144_s12, 128  ;;  %p1203_p11 = scmp.ne.s32.totalorder %s1199_s28, 0 }
  0x43   : > { %v488_v37 = vrot.slane %v432_v36, %v487_v32  ;;  %v498_v38 = vrot.slane %v432_v36, %v497_v33  ;;  %v509_v39 = vrot.slane %v432_v36, %v508_v34  ;;  %v518_v40 = vrot.slane %v432_v36, %v517_v35  ;;  %p871_p8 = scmp.ne.s32.totalorder %s1144_s12, %s870_s27  ;;  %s965_s5 = smov [#allocation5]  }
  0x44   : > { %729 = vmatpush3.bf16.msra.mxu0 %v826_v5  ;;  %v434_v46 = vrot.slane %v432_v36, 1  ;;  %s874_s7 = sshll.u32 %s965_s5, 4  ;;  %s875_s7 = int_to_ptr.vmem [resolvable:$false] %s874_s7 }
  0x45   : > { %730 = vmatprep.subr.bf16.mxu0 %v957_v0  ;;  %p872_p0 = pnand %p871_p8, %p1203_p11  ;;  %s876_s8 = scalar_lea.vmem %s875_s7, 256 }
  0x46   : > { %v436_v49 = vmul.f32 %v434_v46, %v432_v36  ;;  %p877_p13 = scmp.lt.s32.totalorder %s1144_s12, %s875_s7  ;;  %p878_p2 = scmp.lt.s32.totalorder %s876_s8, %s870_s27 }
  0x47   : > { %p873_p6 = pneg %p872_p0 }
  0x48   : > { %731 = vmatpush3.bf16.msra.mxu0 %v827_v6  ;;  %v531_v53 = vrot.slane %v436_v49, %v464_v50  ;;  %p879_p5 = por %p878_p2, %p877_p13 }
  0x49   : > { %732 = vmatprep.subr.bf16.mxu0 %v957_v0 }
  0x4a   : > { %p880_p4 = pnand %p879_p5, %p873_p6 }
  0x4c   : > { %733 = vmatpush3.bf16.msra.mxu0 %v828_v8 }
  0x4d   : > { %734 = vmatprep.subr.bf16.mxu0 %v957_v0 }
  0x50   : > { %735 = vmatpush3.bf16.msra.mxu0 %v829_v10 }
  0x51   : > { %736 = vmatprep.subr.bf16.mxu0 %v957_v0 }
  0x54   : > { %737 = vmatpush3.bf16.msra.mxu0 %v830_v12  ;;  %v475_v12 = vsub.s32 3, %v442_v30 }
  0x55   : > { %738 = vmatprep.subr.bf16.mxu0 %v957_v0  ;;  %v443_v0 = vsub.s32 0, %v442_v30 }
  0x57   : > { %422 = vrot.lane.b32.xlu0 %v420_v9, %s961_s9  ;;  %v444_v5 = vrot.slane %v432_v36, %v443_v0 }
  0x58   : > { %739 = vmatpush3.bf16.msra.mxu0 %v831_v13 }
  0x5b   : > { %438 = vperm.xlu0 %819, %v419_v2  }
  0x5f   : > { %820 = vset.pattern.permute.xlu0 %v963_v14 }
  0x60   : > { %448 = vperm.xlu0 %820, %v419_v2  }
  0x64   : > { %821 = vset.pattern.permute.xlu0 %v959_v7 }
  0x65   : > { %459 = vperm.xlu0 %821, %v419_v2  }
  0x69   : > { %822 = vset.pattern.permute.xlu0 %v964_v15 }
  0x6a   : > { %470 = vperm.xlu0 %822, %v419_v2  }
  0x6e   : > { %823 = vset.pattern.permute.xlu0 %v959_v7 }
  0xb4   : > { %v429_v16 = vpop.permute.xlu1 %428 }
  0xb5   : > { %v431_v17 = vmul.f32 %v429_v16, %v419_v2 }
  0xb7   : > { %525 = vperm.xlu1 %816, %v431_v17   ;;  %v476_v17 = vrot.slane %v432_v36, %v475_v12 }
  0xbb   : > { %817 = vset.pattern.permute.xlu1 %v960_v11  ;;  %v465_v11 = vrot.slane %v432_v36, %v464_v50 }
  0xce   : > { %v306_v18 = vpop.xlane.xlu0 %305 }
  0xcf   : > { %v307_v19 = vsub.f32 %v304_v1, %v306_v18  ;;  %v453_v1 = vsub.s32 1, %v442_v30 }
  0xd1   : > { %v308_v20 = vmul.f32 1.442695, %v307_v19  ;;  %v454_v6 = vrot.slane %v432_v36, %v453_v1 }
  0xd2   : > { %v423_v21 = vpop.permute.xlu0 %422 }
  0xd3   : > { %832 = vpow2.f32 %v308_v20  ;;  %v426_v22 = vadd.f32 %v423_v21, %v419_v2  ;;  %v425_v23 = vsub.f32 %v419_v2, %v423_v21 }
  0xd5   : > { %482 = vperm.xlu1 %817, %v426_v22  }
  0xd9   : > { %492 = vperm.xlu1 %817, %v425_v23  }
  0xda   : > { %v439_v59 = vpop.permute.xlu0 %438 }
  0xdb   : > { %v445_v9 = vsub.f32 %v439_v59, %v444_v5 }
  0xdd   : > { %v833_v24 = vpop.eup %832  ;;  %818 = vset.pattern.permute.xlu1 %v963_v14  ;;  %v446_v14 = vand.u32 2147483647, %v445_v9 }
  0xde   : > { %503 = vperm.xlu1 %818, %v426_v22   ;;  %v312_v25 = vpack.c.bf16 %v833_v24, %v833_v24 }
  0xdf   : > { %v449_v3 = vpop.permute.xlu0 %448 }
  0xe0   : > { %741 = vmatmul.mubr.bf16.vlgmr.msra.gmra.mrb[0].mxu0 %v312_v25  ;;  %v455_v10 = vsub.f32 %v449_v3, %v454_v6 }
  0xe2   : > { %512 = vperm.xlu1 %818, %v425_v23   ;;  %v456_v15 = vand.u32 2147483647, %v455_v10 }
  0xe4   : > { %v460_v8 = vpop.permute.xlu0 %459  ;;  %v457_v19 = vadd.f32 %v456_v15, %v446_v14 }
  0xe5   : > { %v466_v16 = vsub.f32 %v460_v8, %v465_v11 }
  0xe7   : > { %v467_v20 = vand.u32 2147483647, %v466_v16 }
  0xe9   : > { %v471_v18 = vpop.permute.xlu0 %470 }
  0xea   : > { %v477_v21 = vsub.f32 %v471_v18, %v476_v17 }
 0x106   : > { %310 = vadd.xlane.f32.xlu1 %v833_v24 }
 0x136   : > { %v526_v26 = vpop.permute.xlu1 %525 }
 0x137   : > { %v532_v60 = vadd.f32 %v531_v53, %v526_v26  ;;  %v468_v26 = vadd.f32 %v467_v20, %v457_v19 }
 0x154   : > { %v483_v27 = vpop.permute.xlu1 %482 }
 0x155   : > { %v489_v42 = vmin.f32 %v483_v27, %v488_v37  ;;  %v537_v54 = vmax.f32 %v483_v27, %v488_v37  ;;  %v478_v27 = vand.u32 2147483647, %v477_v21 }
 0x157   : > { %v479_v30 = vadd.f32 %v478_v27, %v468_v26 }
 0x158   : > { %v493_v29 = vpop.permute.xlu1 %492 }
 0x159   : > { %v499_v43 = vmax.f32 %v493_v29, %v498_v38  ;;  %v538_v55 = vmin.f32 %v493_v29, %v498_v38 }
 0x15b   : > { %v500_v47 = vsub.f32 %v489_v42, %v499_v43  ;;  %v539_v61 = vsub.f32 %v537_v54, %v538_v55 }
 0x15d   : > { %v504_v31 = vpop.permute.xlu1 %503  ;;  %v501_v51 = vmax.f32 %v500_v47, 0.0 }
 0x15e   : > { %v510_v44 = vmin.f32 %v504_v31, %v509_v39  ;;  %v540_v56 = vmax.f32 %v504_v31, %v509_v39 }
 0x161   : > { %v513_v41 = vpop.permute.xlu1 %512 }
 0x162   : > { %v519_v45 = vmax.f32 %v513_v41, %v518_v40  ;;  %v541_v57 = vmin.f32 %v513_v41, %v518_v40 }
 0x164   : > { %v520_v48 = vsub.f32 %v510_v44, %v519_v45  ;;  %v542_v62 = vsub.f32 %v540_v56, %v541_v57 }
 0x166   : > { %v521_v52 = vmax.f32 %v520_v48, 0.0  ;;  %v543_v2 = vmul.f32 %v542_v62, %v539_v61 }
 0x168   : > { %v522_v58 = vmul.f32 %v521_v52, %v501_v51  ;;  %v544_v7 = vadd.f32 1e-08, %v543_v2 }
 0x16a   : > { %v533_v63 = vsub.f32 %v532_v60, %v522_v58 }
 0x16c   : > { %v534_v4 = vadd.f32 1e-08, %v533_v63  ;;  %v546_v25 = vsub.f32 %v543_v2, %v533_v63 }
 0x16e   : > { %834 = vrcp.f32 %v534_v4 }
 0x16f   : > { %836 = vrcp.f32 %v544_v7 }
 0x178   : > { %v835_v22 = vpop.eup %834 }
 0x179   : > { %v837_v23 = vpop.eup %836  ;;  %v536_v24 = vmul.f32 %v835_v22, %v522_v58 }
 0x17a   : > { %v547_v28 = vmul.f32 %v837_v23, %v546_v25 }
 0x17c   : > { %v548_v31 = vsub.f32 %v536_v24, %v547_v28 }
 0x17e   : > { %v549_v34 = vsub.f32 %v479_v30, %v548_v31 }
 0x193   : > { %v311_v13 = vpop.xlane.xlu1 %310 }
 0x194   : > { %838 = vrcp.f32 %v311_v13 }
 0x19e   : > { %v839_v29 = vpop.eup %838 }
 0x19f   : > { %v418_v32 = vmul.f32 -1.0, %v839_v29 }
 0x1b3   : > { %v411_v33 = vpop.f32.mrb[0].mxu0 }
 0x1b4   : > { %v550_v35 = vmul.f32 %v418_v32, %v411_v33  ;;  %v742_v36 = vpop.f32.mrb[1].mxu0 }
 0x1b5   : > { %v414_v37 = vpop.f32.mrb[2].mxu0 }
 0x1b6   : > { %v551_v38 = vadd.f32 %v550_v35, %v549_v34  ;;  %v743_v39 = vpop.f32.mrb[3].mxu0 }
 0x1b8   : > { %552 = vst [vmem:[%s284_s10] sm:$0xff] %v551_v38 }
 0x1b9   : > { %883 = shalt.err (!%p880_p4)
}
 0x1ba   : > { %s884_s22 = scalar_lea.hbm %s1142_s6, 128  ;;  %s888_s21 = scalar_lea.hbm %s1195_s4, 256 }
 0x1bb   : > { %p885_p7 = scmp.ne.s32.totalorder %s1142_s6, %s884_s22  ;;  %p889_p1 = scmp.lt.u32.totalorder %s1142_s6, %s1195_s4 }
 0x1bc   : > { %p890_p3 = scmp.lt.u32.totalorder %s888_s21, %s884_s22  ;;  %p892_p8 = scmp.lt.u32.totalorder %s884_s22, %s1142_s6 }
 0x1bd   : > { %p886_p10 = pnand %p885_p7, %p1203_p11 }
 0x1be   : > { %p891_p9 = por %p890_p3, %p889_p1 }
 0x1bf   : > { %p887_p12 = pneg %p886_p10 }
 0x1c0   : > { %p893_p0 = por %p892_p8, %p891_p9 }
 0x1c2   : > { %p894_p6 = pnand %p893_p0, %p887_p12 }
 0x1c4   : > { %897 = shalt.err (!%p894_p6)
}
 0x1c5   : > { %746 = dma.vmem_to_hbm [thread:$0]  (%p1203_p11), %s1144_s12, 128, %s1142_s6, %s554_s18  }
 0x1c6 PF: > { %s580_s26 = sand.u32 1, %s932_s15   ;;  %p1204_p13 = scmp.ne.s32.totalorder %s1200_s30, 0 }
 0x1c7   : > { %p1205_p2 = scmp.ge.s32.totalorder %s952_s20, 2  ;;  %s581_s10 = scalar_lea.sflag [#allocation4], %s580_s26 }
 0x1c9   : > { %p753_p5 = pnand %p1205_p2, %p1204_p13 }
 0x1cb   : > { %927 = dma.done.wait (!%p753_p5), %s581_s10, 128  }
 0x1cc   : > { %929 = vsyncadd (!%p753_p5), %s581_s10, 4294967168  ;;  %s20_s20 = sadd.s32 1, %s952_s20   ;;  %s1206_s15 = smov %s936_s16 }
 0x1cd   : > { %p17_p4 = scmp.ge.s32.totalorder %s20_s20, 4   ;;  %s1207_s16 = smov %s940_s17 }
 0x1ce   : > { %s1208_s17 = smov %s1047_s29  ;;  %s1209_s18 = smov %s948_s19 }
 0x1cf   : > { %s1210_s19 = smov %s1212_s23  ;;  %19 = sbr.rel (!%p17_p4) target bundleno = 6 (0x6), region = 90 }
 0x1d6   :  { %586 = vsyncpa [#allocation3], 1 }
 0x1d7   :  { %588 = vsyncpa [#allocation3 + $0x1], 1 }
 0x1d8   :  { %589 = vsyncpa [#allocation4], 1 }
 0x1d9   :  { %591 = vsyncpa [#allocation4 + $0x1], 1 }

</bundles_post_ra>
